<compile_context>
chip_gen: v7x
topology: tpu7x:2x2x1
jax: 0.10.0
libtpu: 0.0.40
codegen_flags: <defaults>
</compile_context>

<pallas_src>
import functools

import jax
import jax.numpy as jnp
from jax.experimental import pallas as pl
from jax.experimental.pallas import tpu as pltpu

D_IN, D_HID, D_OUT = 20, 256, 10
D_OUT_PAD = 128            # pad output features to a full 128-lane tile
_DEFAULT_TILE = 512        # target batch tile for large batches (multiple of 8)


def _round_up(n, m):
    return ((n + m - 1) // m) * m


def mlp_kernel(x_ref, w1_ref, b1_ref, w2_ref, b2_ref, o_ref):
    # (tm, 20) bf16 @ (20, 256) bf16 -> f32 accumulate on the MXU.
    h = jnp.dot(x_ref[...], w1_ref[...], preferred_element_type=jnp.float32)
    h = jnp.maximum(h + b1_ref[...], 0.0)                     # bias + ReLU in f32
    # (tm, 256) bf16 @ (256, 128) bf16 -> f32; columns 10..127 are zero pads,
    # so the extra lanes are free MXU work and give unmasked full-lane stores.
    o = jnp.dot(h.astype(w2_ref.dtype), w2_ref[...],
                preferred_element_type=jnp.float32)
    o_ref[...] = (o + b2_ref[...]).astype(o_ref.dtype)


def prepare_params(w1, b1, w2, b2, *, compute_dtype=jnp.bfloat16):
    """One-time parameter prep (transpose / pad / cast). Call once, reuse."""
    w1t = jnp.transpose(w1).astype(compute_dtype)                      # (20, 256)
    w2t = jnp.transpose(w2).astype(compute_dtype)                      # (256, 10)
    w2t = jnp.pad(w2t, ((0, 0), (0, D_OUT_PAD - D_OUT)))               # (256, 128)
    b1r = b1.reshape(1, D_HID).astype(jnp.float32)                     # (1, 256)
    b2r = jnp.pad(b2.reshape(1, D_OUT).astype(jnp.float32),
                  ((0, 0), (0, D_OUT_PAD - D_OUT)))                    # (1, 128)
    return w1t, b1r, w2t, b2r


def _choose_tm(batch):
    # Small batches: one tile rounded up to a multiple of 8 (sublane rule).
    # Large batches: 512-row tiles -> many grid steps (pipelining + megacore),
    # ~0.5 MiB f32 hidden temp per step, comfortably inside scoped VMEM.
    if batch <= _DEFAULT_TILE:
        return max(8, _round_up(batch, 8))
    return _DEFAULT_TILE


@functools.partial(jax.jit, static_argnames=("tm",))
def mlp_forward_prepared(x, w1t, b1r, w2t, b2r, *, tm=None):
    """x: (B, 20) float; params from prepare_params(). Returns (B, 10) f32."""
    B = x.shape[0]
    tm = _choose_tm(B) if tm is None else tm
    assert tm % 8 == 0, "batch tile must be a multiple of 8"

    x = x.astype(w1t.dtype)                 # bf16 activations, f32 accumulation
    grid = (pl.cdiv(B, tm),)                # ragged last tile handled by Pallas

    flops = 2 * B * (D_IN * D_HID + D_HID * D_OUT_PAD)
    bytes_accessed = (B * D_IN * x.dtype.itemsize
                      + B * D_OUT_PAD * 4
                      + w1t.size * w1t.dtype.itemsize
                      + w2t.size * w2t.dtype.itemsize
                      + (b1r.size + b2r.size) * 4)

    out_padded = pl.pallas_call(
        mlp_kernel,
        out_shape=jax.ShapeDtypeStruct((B, D_OUT_PAD), jnp.float32),
        grid_spec=pltpu.PrefetchScalarGridSpec(
            num_scalar_prefetch=0,
            grid=grid,
            in_specs=[
                pl.BlockSpec((tm, D_IN), lambda i: (i, 0)),          # x tile
                pl.BlockSpec((D_IN, D_HID), lambda i: (0, 0)),       # W1^T resident
                pl.BlockSpec((1, D_HID), lambda i: (0, 0)),          # b1
                pl.BlockSpec((D_HID, D_OUT_PAD), lambda i: (0, 0)),  # W2^T padded
                pl.BlockSpec((1, D_OUT_PAD), lambda i: (0, 0)),      # b2 padded
            ],
            out_specs=pl.BlockSpec((tm, D_OUT_PAD), lambda i: (i, 0)),
        ),
        compiler_params=pltpu.CompilerParams(
            dimension_semantics=("parallel",),
        ),
        cost_estimate=pl.CostEstimate(
            flops=flops, transcendentals=0, bytes_accessed=bytes_accessed),
    )(x, w1t, b1r, w2t, b2r)

    return out_padded[:, :D_OUT]


def mlp_forward(x, w1, b1, w2, b2, *, tm=None):
    """Convenience wrapper taking raw PyTorch-layout params (out, in)."""
    params = prepare_params(w1, b1, w2, b2)
    return mlp_forward_prepared(x, *params, tm=tm)


def mlp_ref(x, w1, b1, w2, b2):
    h = jnp.maximum(x @ w1.T + b1, 0.0)
    return h @ w2.T + b2


if __name__ == "__main__":
    key = jax.random.PRNGKey(0)
    kx, kw1, kb1, kw2, kb2 = jax.random.split(key, 5)

    B = 8
    x = jax.random.normal(kx, (B, D_IN), dtype=jnp.float32)
    # PyTorch nn.Linear layout: weight (out_features, in_features).
    w1 = jax.random.normal(kw1, (D_HID, D_IN), dtype=jnp.float32) * 0.05
    b1 = jax.random.normal(kb1, (D_HID,), dtype=jnp.float32) * 0.05
    w2 = jax.random.normal(kw2, (D_OUT, D_HID), dtype=jnp.float32) * 0.05
    b2 = jax.random.normal(kb2, (D_OUT,), dtype=jnp.float32) * 0.05

    # Prepare params once (transpose / pad / bf16 cast hoisted out of hot path).
    params = prepare_params(w1, b1, w2, b2)

    out = mlp_forward_prepared(x, *params)
    out = jax.block_until_ready(out)

    ref = mlp_ref(x, w1, b1, w2, b2)
    assert out.shape == (B, D_OUT)
    # bf16 matmul inputs with f32 accumulation -> loose tolerance vs f32 ref.
    assert jnp.allclose(out, ref, atol=2e-2, rtol=2e-2), \
        f"max abs err {jnp.max(jnp.abs(out - ref))}"

    print("KERNEL_OK")
</pallas_src>

<mosaic_0001>
module attributes {stable_mosaic.version = 11 : i64} {
  func.func @mlp_kernel(%arg0: i32, %arg1: memref<8x20xbf16, #tpu.memory_space<vmem>>, %arg2: memref<20x256xbf16, #tpu.memory_space<vmem>>, %arg3: memref<1x256xf32, #tpu.memory_space<vmem>>, %arg4: memref<256x128xbf16, #tpu.memory_space<vmem>>, %arg5: memref<1x128xf32, #tpu.memory_space<vmem>>, %arg6: memref<8x128xf32, #tpu.memory_space<vmem>>) attributes {dimension_semantics = [#tpu.dimension_semantics<parallel>], iteration_bounds = array<i64: 1>, scalar_prefetch = 0 : i64, scratch_operands = 0 : i64, tpu.core_type = #tpu.core_type<tc>, window_params = [{transform_indices = @transform_0, window_bounds = array<i64: 8, 20>}, {pipeline_mode = #tpu.pipeline_mode<synchronous>, transform_indices = @transform_1, window_bounds = array<i64: 20, 256>}, {pipeline_mode = #tpu.pipeline_mode<synchronous>, transform_indices = @transform_2, window_bounds = array<i64: 1, 256>}, {pipeline_mode = #tpu.pipeline_mode<synchronous>, transform_indices = @transform_3, window_bounds = array<i64: 256, 128>}, {pipeline_mode = #tpu.pipeline_mode<synchronous>, transform_indices = @transform_4, window_bounds = array<i64: 1, 128>}, {transform_indices = @transform_5, window_bounds = array<i64: 8, 128>}]} {
    %c0 = arith.constant 0 : index
    %c0_0 = arith.constant 0 : index
    %0 = vector.load %arg1[%c0, %c0_0] : memref<8x20xbf16, #tpu.memory_space<vmem>>, vector<8x20xbf16>
    %c0_1 = arith.constant 0 : index
    %c0_2 = arith.constant 0 : index
    %1 = vector.load %arg2[%c0_1, %c0_2] : memref<20x256xbf16, #tpu.memory_space<vmem>>, vector<20x256xbf16>
    %cst = arith.constant dense<0.000000e+00> : vector<8x256xf32>
    %2 = tpu.matmul %0, %1, %cst {dimension_numbers = #tpu.dot_dimension_numbers<[1], [0], [0], [1], [0, 0, 1, 1], [], []>} : vector<8x20xbf16>, vector<20x256xbf16>, vector<8x256xf32> -> vector<8x256xf32>
    %c0_3 = arith.constant 0 : index
    %c0_4 = arith.constant 0 : index
    %3 = vector.load %arg3[%c0_3, %c0_4] : memref<1x256xf32, #tpu.memory_space<vmem>>, vector<1x256xf32>
    %4 = vector.broadcast %3 : vector<1x256xf32> to vector<8x256xf32>
    %5 = arith.addf %2, %4 : vector<8x256xf32>
    %cst_5 = arith.constant 0.000000e+00 : f32
    %6 = vector.broadcast %cst_5 : f32 to vector<8x256xf32>
    %7 = arith.maximumf %5, %6 : vector<8x256xf32>
    %8 = arith.truncf %7 : vector<8x256xf32> to vector<8x256xbf16>
    %c0_6 = arith.constant 0 : index
    %c0_7 = arith.constant 0 : index
    %9 = vector.load %arg4[%c0_6, %c0_7] : memref<256x128xbf16, #tpu.memory_space<vmem>>, vector<256x128xbf16>
    %cst_8 = arith.constant dense<0.000000e+00> : vector<8x128xf32>
    %10 = tpu.matmul %8, %9, %cst_8 {dimension_numbers = #tpu.dot_dimension_numbers<[1], [0], [0], [1], [0, 0, 1, 1], [], []>} : vector<8x256xbf16>, vector<256x128xbf16>, vector<8x128xf32> -> vector<8x128xf32>
    %c0_9 = arith.constant 0 : index
    %c0_10 = arith.constant 0 : index
    %11 = vector.load %arg5[%c0_9, %c0_10] : memref<1x128xf32, #tpu.memory_space<vmem>>, vector<1x128xf32>
    %12 = vector.broadcast %11 : vector<1x128xf32> to vector<8x128xf32>
    %13 = arith.addf %10, %12 : vector<8x128xf32>
    %c0_11 = arith.constant 0 : index
    %c0_12 = arith.constant 0 : index
    %14 = vector.load %arg6[%c0_11, %c0_12] : memref<8x128xf32, #tpu.memory_space<vmem>>, vector<8x128xf32>
    tpu.vector_store %arg6[%c0_11, %c0_12], %13 {strides = array<i32>} : memref<8x128xf32, #tpu.memory_space<vmem>>, vector<8x128xf32>,
    return
  }
  func.func @transform_0(%arg0: i32) -> (i32, i32) {
    %c0_i32 = arith.constant 0 : i32
    %c0_i32_0 = arith.constant 0 : i32
    return %arg0, %c0_i32 : i32, i32
  }
  func.func @transform_1(%arg0: i32) -> (i32, i32) {
    %c0_i32 = arith.constant 0 : i32
    %c0_i32_0 = arith.constant 0 : i32
    %c0_i32_1 = arith.constant 0 : i32
    return %c0_i32, %c0_i32_0 : i32, i32
  }
  func.func @transform_2(%arg0: i32) -> (i32, i32) {
    %c0_i32 = arith.constant 0 : i32
    %c0_i32_0 = arith.constant 0 : i32
    %c0_i32_1 = arith.constant 0 : i32
    return %c0_i32, %c0_i32_0 : i32, i32
  }
  func.func @transform_3(%arg0: i32) -> (i32, i32) {
    %c0_i32 = arith.constant 0 : i32
    %c0_i32_0 = arith.constant 0 : i32
    %c0_i32_1 = arith.constant 0 : i32
    return %c0_i32, %c0_i32_0 : i32, i32
  }
  func.func @transform_4(%arg0: i32) -> (i32, i32) {
    %c0_i32 = arith.constant 0 : i32
    %c0_i32_0 = arith.constant 0 : i32
    %c0_i32_1 = arith.constant 0 : i32
    return %c0_i32, %c0_i32_0 : i32, i32
  }
  func.func @transform_5(%arg0: i32) -> (i32, i32) {
    %c0_i32 = arith.constant 0 : i32
    %c0_i32_0 = arith.constant 0 : i32
    return %arg0, %c0_i32 : i32, i32
  }
}

</mosaic_0001>

<bundles_post_ra>
// kernel: mlp_forward_prepared.1
= control target key start
LH: loop header
LB: loop body
LE: loop exit
PB: predicated region body
PF: predicated region fallthrough
CT: control target
= control target key end

     0   :  { %10 = vsyncpa [#allocation3], 0  ;;  %s558_s0 = inlined_call_operand.vmem [shape: bf16[8,20], index: 0, kind: input, shape index: {}]   ;;  %s559_s1 = inlined_call_operand.hbm [shape: bf16[20,256], index: 1, kind: input, shape index: {}]   ;;  %s560_s2 = inlined_call_operand.vmem [shape: f32[1,256], index: 2, kind: input, shape index: {}]   ;;  %s561_s3 = inlined_call_operand.hbm [shape: bf16[256,128], index: 3, kind: input, shape index: {}]   ;;  %s562_s4 = inlined_call_operand.vmem [shape: f32[1,128], index: 4, kind: input, shape index: {}]   ;;  %s563_s5 = inlined_call_operand.hbm [shape: f32[8,128], index: 5, kind: output, shape index: {}]  }
   0x1   :  { %11 = vsyncpa [#allocation6], 0 }
   0x2   :  { %12 = vsyncpa [#allocation4], 0  ;;  %s475_s18 = smov [#allocation2]   ;;  %s403_s22 = scalar_lea.hbm %s559_s1, 384 }
   0x3   :  { %s20_s19 = sshll.u32 %s475_s18, 4  ;;  %p404_p0 = scmp.ne.s32.totalorder %s559_s1, %s403_s22  ;;  %s21_s19 = int_to_ptr.vmem [resolvable:$true] %s20_s19 }
   0x4   :  { %p407_p1 = scmp.lt.u32.totalorder %s403_s22, %s559_s1 }
   0x6   :  { %p409_p2 = pnand %p407_p1, %p404_p0 }
   0x8   :  { %412 = shalt.err (!%p409_p2)
}
   0x9   :  { %s413_s27 = scalar_lea.vmem %s21_s19, 384  ;;  %p418_p4 = scmp.lt.s32.totalorder %s21_s19, %s21_s19 }
   0xa   :  { %p414_p3 = scmp.ne.s32.totalorder %s21_s19, %s413_s27  ;;  %p419_p5 = scmp.lt.s32.totalorder %s413_s27, %s413_s27 }
   0xc   :  { %p420_p6 = por %p419_p5, %p418_p4 }
   0xe   :  { %p421_p7 = pnand %p420_p6, %p414_p3 }
  0x10   :  { %424 = shalt.err (!%p421_p7)
}
  0x11   :  { %s476_s28 = smov 128   ;;  %s477_s29 = smov 8  }
  0x12   :  { %26 = dma.hbm_to_vmem [thread:$0]  %s559_s1, 384, %s21_s19, [#allocation3], %s476_s28, %s476_s28, %s477_s29  }
  0x13   :  { %s478_s7 = smov [#allocation5]   ;;  %s425_s11 = scalar_lea.hbm %s561_s3, 2048 }
  0x14   :  { %s34_s8 = sshll.u32 %s478_s7, 4  ;;  %p426_p8 = scmp.ne.s32.totalorder %s561_s3, %s425_s11  ;;  %s35_s8 = int_to_ptr.vmem [resolvable:$true] %s34_s8 }
  0x15   :  { %p429_p9 = scmp.lt.u32.totalorder %s425_s11, %s561_s3 }
  0x17   :  { %p431_p10 = pnand %p429_p9, %p426_p8 }
  0x19   :  { %434 = shalt.err (!%p431_p10)
}
  0x1a   :  { %s435_s16 = scalar_lea.vmem %s35_s8, 2048  ;;  %p440_p12 = scmp.lt.s32.totalorder %s35_s8, %s35_s8 }
  0x1b   :  { %p436_p11 = scmp.ne.s32.totalorder %s35_s8, %s435_s16  ;;  %p441_p13 = scmp.lt.s32.totalorder %s435_s16, %s435_s16 }
  0x1d   :  { %p442_p0 = por %p441_p13, %p440_p12 }
  0x1f   :  { %p443_p1 = pnand %p442_p0, %p436_p11 }
  0x21   :  { %446 = shalt.err (!%p443_p1)
}
  0x22   :  { %s479_s1 = smov 64   ;;  %s480_s17 = smov 4  }
  0x23   :  { %40 = dma.hbm_to_vmem [thread:$0]  %s561_s3, 2048, %s35_s8, [#allocation6], %s479_s1, %s479_s1, %s480_s17  }
  0x24   :  { %469 = dma.done.wait [#allocation3], 384  }
  0x25   :  { %470 = vsyncadd [#allocation3], 4294966912 }
  0x26   :  { %471 = dma.done.wait [#allocation6], 2048  }
  0x27   :  { %472 = vsyncadd [#allocation6], 4294965248  ;;  %v481_v0 = vmov 0   ;;  %v382_v1 = vld [vmem:[#allocation2 + $0x4] ss:$8 sps:$4 sm:$0xff]   ;;  %vm85_vm0 = vcmask 1041408   ;;  %v56_v24 = vlaneseq }
  0x28   :  { %124 = vmatprep.mubr.bf16.mxu0 %v481_v0  ;;  %v384_v2 = vld [vmem:[#allocation2] ss:$8 sps:$4 sm:$0xff]   ;;  %v53_v3 = vld [vmem:[#allocation2 + $0x10] sm:$0x33]  ;;  %92 = vmatprep.subr.bf16.mxu0 %v382_v1  ;;  %v387_v6 = vld [vmem:[#allocation5 + $0x40] sm:$0xff]   ;;  %vm81_vm1 = vcmask 162816  }
  0x29   :  { %v332_v4 = vcombine.high %v53_v3, %v53_v3  ;;  %v331_v5 = vcombine.low %v53_v3, %v53_v3  ;;  %93 = vmatpush1.bf16.msra.mxu0 %v384_v2  ;;  %v388_v7 = vld [vmem:[#allocation5] sm:$0xff]   ;;  %352 = vmatprep.subr.bf16.mxu1 %v387_v6  ;;  %v389_v9 = vld [vmem:[#allocation5 + $0x48] sm:$0xff]   ;;  %v391_v11 = vld [vmem:[#allocation5 + $0x50] sm:$0xff]   ;;  %v57_v25 = vshrl.u32 %v56_v24, 7 }
  0x2a   :  { %353 = vmatpush3.bf16.msra.mxu1 %v388_v7  ;;  %v390_v10 = vld [vmem:[#allocation5 + $0x8] sm:$0xff]   ;;  %v50_v12 = vld [vmem:[%s558_s0] sm:$0xf]  ;;  %v392_v13 = vld [vmem:[#allocation5 + $0x10] sm:$0xff]  }
  0x2b   :  { %333 = vmatprep.subr.msk.bf16.mxu0 %vm85_vm0, %v332_v4  ;;  %v87_v8 = vsel %vm85_vm0, %v331_v5, 0  ;;  %354 = vmatprep.subr.bf16.mxu1 %v389_v9  ;;  %v393_v14 = vld [vmem:[#allocation5 + $0x58] sm:$0xff]   ;;  %v395_v16 = vld [vmem:[#allocation5 + $0x60] sm:$0xff]   ;;  %v397_v18 = vld [vmem:[#allocation5 + $0x68] sm:$0xff]   ;;  %v58_v26 = vsub.s32 0, %v57_v25  ;;  %v62_v28 = vsub.s32 1, %v57_v25 }
  0x2c   :  { %v394_v15 = vld [vmem:[#allocation5 + $0x18] sm:$0xff]   ;;  %v396_v17 = vld [vmem:[#allocation5 + $0x20] sm:$0xff]   ;;  %v398_v19 = vld [vmem:[#allocation5 + $0x28] sm:$0xff]  }
  0x2d   :  { %95 = vmatpush1.bf16.msra.mxu0 %v87_v8  ;;  %v399_v20 = vld [vmem:[#allocation5 + $0x70] sm:$0xff]   ;;  %v401_v22 = vld [vmem:[#allocation5 + $0x78] sm:$0xff]   ;;  %v54_v27 = vld [vmem:[%s560_s2] sm:$0x3]  ;;  %s482_s2 = smov [#allocation7]  }
  0x2e   :  { %355 = vmatpush3.bf16.msra.mxu1 %v390_v10  ;;  %v400_v21 = vld [vmem:[#allocation5 + $0x30] sm:$0xff]   ;;  %v402_v23 = vld [vmem:[#allocation5 + $0x38] sm:$0xff]   ;;  %v59_v29 = vrot.slane %v54_v27, %v58_v26  ;;  %v63_v30 = vrot.slane %v54_v27, %v62_v28  ;;  %v335_v42 = vld [vmem:[%s562_s4] ss:$0 sm:$0xff]  ;;  %s319_s24 = sshll.u32 %s482_s2, 4  ;;  %s320_s24 = int_to_ptr.vmem [resolvable:$true] %s319_s24 }
  0x2f   :  { %356 = vmatprep.subr.bf16.mxu1 %v391_v11  ;;  %s447_s25 = scalar_lea.vmem %s320_s24, 128  ;;  %p452_p3 = scmp.lt.s32.totalorder %s320_s24, %s320_s24 }
  0x30   :  { %334 = vmatmul.mubr.msk.bf16.vlgmr.msra.gmra.mrb[0].mxu0 %vm81_vm1, %v50_v12  ;;  %p448_p2 = scmp.ne.s32.totalorder %s320_s24, %s447_s25  ;;  %p453_p4 = scmp.lt.s32.totalorder %s447_s25, %s447_s25 }
  0x32   :  { %357 = vmatpush3.bf16.msra.mxu1 %v392_v13  ;;  %p454_p5 = por %p453_p4, %p452_p3 }
  0x33   :  { %358 = vmatprep.subr.bf16.mxu1 %v393_v14 }
  0x34   :  { %p455_p6 = pnand %p454_p5, %p448_p2 }
  0x36   :  { %359 = vmatpush3.bf16.msra.mxu1 %v394_v15 }
  0x37   :  { %360 = vmatprep.subr.bf16.mxu1 %v395_v16 }
  0x3a   :  { %361 = vmatpush3.bf16.msra.mxu1 %v396_v17 }
  0x3b   :  { %362 = vmatprep.subr.bf16.mxu1 %v397_v18 }
  0x3e   :  { %363 = vmatpush3.bf16.msra.mxu1 %v398_v19 }
  0x3f   :  { %364 = vmatprep.subr.bf16.mxu1 %v399_v20 }
  0x42   :  { %365 = vmatpush3.bf16.msra.mxu1 %v400_v21 }
  0x43   :  { %366 = vmatprep.subr.bf16.mxu1 %v401_v22 }
  0x46   :  { %367 = vmatpush3.bf16.msra.mxu1 %v402_v23 }
 0x103   :  { %v126_v31 = vpop.f32.mrb[0].mxu0 }
 0x104   :  { %v127_v32 = vadd.f32 %v126_v31, %v59_v29  ;;  %v128_v33 = vpop.f32.mrb[1].mxu0 }
 0x105   :  { %v129_v34 = vadd.f32 %v128_v33, %v63_v30  ;;  %v130_v35 = vpop.f32.mrb[2].mxu0 }
 0x106   :  { %v133_v36 = vmax.f32 %v127_v32, 0.0  ;;  %v131_v37 = vpop.f32.mrb[3].mxu0 }
 0x107   :  { %v134_v38 = vmax.f32 %v129_v34, 0.0 }
 0x108   :  { %v135_v40 = vpack.c.bf16 %v133_v36, %v133_v36 }
 0x109   :  { %v136_v39 = vpack.c.bf16 %v134_v38, %v134_v38 }
 0x10b   :  { %304 = vmatprep.mubr.bf16.mxu1 %v136_v39 }
 0x10c   :  { %305 = vmatmul.mubr.bf16.vlgmr.msra.gmra.mrb[0].mxu1 %v135_v40 }
 0x1df   :  { %v368_v41 = vpop.f32.mrb[0].mxu1 }
 0x1e0   :  { %v369_v43 = vpop.f32.mrb[1].mxu1 }
 0x1e1   :  { %v370_v44 = vadd.f32 %v369_v43, %v368_v41  ;;  %v371_v45 = vpop.f32.mrb[2].mxu1 }
 0x1e2   :  { %v372_v46 = vpop.f32.mrb[3].mxu1 }
 0x1e3   :  { %v307_v47 = vadd.f32 %v370_v44, %v335_v42 }
 0x1e5   :  { %312 = vst [vmem:[#allocation7] sm:$0xff] %v307_v47 }
 0x1e6   :  { %458 = shalt.err (!%p455_p6)
}
 0x1e7   :  { %s459_s4 = scalar_lea.hbm %s563_s5, 128 }
 0x1e8   :  { %p460_p7 = scmp.ne.s32.totalorder %s563_s5, %s459_s4  ;;  %p463_p8 = scmp.lt.u32.totalorder %s459_s4, %s563_s5 }
 0x1ea   :  { %p465_p9 = pnand %p463_p8, %p460_p7 }
 0x1ec   :  { %468 = shalt.err (!%p465_p9)
}
 0x1ed   :  { %322 = dma.vmem_to_hbm [thread:$0]  %s320_s24, 128, %s563_s5, [#allocation4]  }
 0x1ee   :  { %473 = dma.done.wait [#allocation4], 128  }
 0x1ef   :  { %474 = vsyncadd [#allocation4], 4294967168 }
 0x1f0   :  { %326 = vsyncpa [#allocation3], 1 }
 0x1f1   :  { %327 = vsyncpa [#allocation6], 1 }
 0x1f2   :  { %328 = vsyncpa [#allocation4], 1 }

</bundles_post_ra>
